<compile_context>
chip_gen: v6e
topology: v6e:2x2x1
jax: 0.10.0
libtpu: 0.0.40
codegen_flags: <defaults>
</compile_context>

<pallas_src>
import jax
import jax.numpy as jnp
from jax import lax
from jax.experimental import pallas as pl
from jax.experimental.pallas import tpu as pltpu


def _round_up(x, m):
    return (x + m - 1) // m * m


def _pair_generation_kernel(x_ref, w_ref, o_ref, h_ref):
    """One (batch, row-tile) grid step.

    x_ref: (1, Sp, Fp)  full padded batch slab (re-DMA'd only when b changes)
    w_ref: (Fp, Fp)     resident weight (unblocked, single VMEM copy)
    o_ref: (1, TS, Sp)  one row tile of the output Gram matrix
    h_ref: (Sp, Fp)     f32 scratch: H = X_b @ W for the current batch
    """
    i = pl.program_id(1)

    # Compute the full per-batch hidden matrix once; reuse for all row tiles.
    @pl.when(i == 0)
    def _():
        h_ref[...] = jnp.dot(x_ref[0], w_ref[...],
                             preferred_element_type=jnp.float32)

    ts = o_ref.shape[1]
    start = pl.multiple_of(i * ts, ts)
    h_rows = h_ref[pl.ds(start, ts), :]                       # (TS, Fp)
    # (TS, Fp) x (Sp, Fp) contracted on the feature axis -> (TS, Sp),
    # i.e. H_rows @ H^T without materializing a transpose.
    gram = lax.dot_general(h_rows, h_ref[...],
                           dimension_numbers=(((1,), (1,)), ((), ())),
                           preferred_element_type=jnp.float32)
    o_ref[0] = gram.astype(o_ref.dtype)


def pair_generation(text, weight, bias=None, *, row_tile=512):
    """Pallas TPU implementation of PairGeneration.forward.

    text:   (B, S, F) any float dtype (cast to f32, like the module)
    weight: (F, F)
    bias:   optional (F,) — the module's broadcast only makes sense when S == F
    returns (B, S, S) float32
    """
    B, S, F = text.shape
    assert weight.shape == (F, F)

    # Lane-dense padding: last dims become multiples of 128 so MXU tiles and
    # output stores are full-width.  Zero padding is exact: padded feature
    # columns / weight rows contribute nothing to X@W, and padded sequence
    # rows give zero output rows/cols which are sliced away below.
    ts = min(int(row_tile), _round_up(S, 128))
    Sp = _round_up(S, ts)
    Fp = _round_up(F, 128)

    x = jnp.pad(text.astype(jnp.float32), ((0, 0), (0, Sp - S), (0, Fp - F)))
    w = jnp.pad(weight.astype(jnp.float32), ((0, Fp - F), (0, Fp - F)))

    grid = (B, Sp // ts)

    out = pl.pallas_call(
        _pair_generation_kernel,
        out_shape=jax.ShapeDtypeStruct((B, Sp, Sp), jnp.float32),
        grid=grid,
        in_specs=[
            # Full padded batch slab; block index ignores the row-tile axis,
            # so it is DMA'd once per batch and reused across row tiles.
            pl.BlockSpec((1, Sp, Fp), lambda b, i: (b, 0, 0)),
            # Weight: single resident VMEM copy (no per-step double buffer).
            pl.BlockSpec(memory_space=pltpu.MemorySpace.VMEM),
        ],
        out_specs=pl.BlockSpec((1, ts, Sp), lambda b, i: (b, i, 0)),
        scratch_shapes=[pltpu.VMEM((Sp, Fp), jnp.float32)],
        compiler_params=pltpu.CompilerParams(
            dimension_semantics=("parallel", "arbitrary")),
    )(x, w)

    out = out[:, :S, :S]
    if bias is not None:
        # Module quirk: bias has shape (F,), broadcast over the last output
        # axis; only valid when S == F (as in the PyTorch module).
        out = out + bias.astype(jnp.float32)
    return out


if __name__ == "__main__":
    bs, seq_len, features = 2, 8, 32
    key = jax.random.PRNGKey(0)
    kx, kw = jax.random.split(key)
    text = jax.random.normal(kx, (bs, seq_len, features), jnp.float32)
    bound = 1.0 / (features ** 0.5)
    weight = jax.random.uniform(kw, (features, features), jnp.float32,
                                -bound, bound)

    out = pair_generation(text, weight)   # default bias=False path
    jax.block_until_ready(out)

    # Pure-JAX reference (same math as the PyTorch module).
    hidden = jnp.matmul(text.astype(jnp.float32), weight,
                        precision=lax.Precision.HIGHEST)
    ref = jnp.matmul(hidden, jnp.swapaxes(hidden, 1, 2),
                     precision=lax.Precision.HIGHEST)

    assert out.shape == (bs, seq_len, seq_len), out.shape
    assert jnp.allclose(out, ref, atol=1e-2, rtol=1e-2), \
        float(jnp.max(jnp.abs(out - ref)))
    print("KERNEL_OK")
</pallas_src>

<mosaic_0001>
module attributes {stable_mosaic.version = 11 : i64} {
  func.func @_pair_generation_kernel(%arg0: i32, %arg1: i32, %arg2: memref<1x128x128xf32, #tpu.memory_space<vmem>>, %arg3: memref<128x128xf32, #tpu.memory_space<vmem>>, %arg4: memref<1x128x128xf32, #tpu.memory_space<vmem>>, %arg5: memref<128x128xf32, #tpu.memory_space<vmem>>) attributes {dimension_semantics = [#tpu.dimension_semantics<parallel>, #tpu.dimension_semantics<arbitrary>], iteration_bounds = array<i64: 2, 1>, scalar_prefetch = 0 : i64, scratch_operands = 1 : i64, tpu.core_type = #tpu.core_type<tc>, window_params = [{transform_indices = @transform_0, window_bounds = array<i64: 1, 128, 128>}, {pipeline_mode = #tpu.pipeline_mode<synchronous>, transform_indices = @transform_1, window_bounds = array<i64: 128, 128>}, {transform_indices = @transform_2, window_bounds = array<i64: 1, 128, 128>}]} {
    %c0_i32 = arith.constant 0 : i32
    %0 = arith.cmpi eq, %arg1, %c0_i32 : i32
    %1 = arith.extui %0 : i1 to i32
    %c0_i32_0 = arith.constant 0 : i32
    %2 = arith.cmpi ne, %1, %c0_i32_0 : i32
    scf.if %2 {
      %c0_6 = arith.constant 0 : index
      %c0_7 = arith.constant 0 : index
      %c0_8 = arith.constant 0 : index
      %12 = vector.load %arg2[%c0_6, %c0_7, %c0_8] : memref<1x128x128xf32, #tpu.memory_space<vmem>>, vector<1x128x128xf32>
      %13 = vector.shape_cast %12 : vector<1x128x128xf32> to vector<128x128xf32>
      %c0_9 = arith.constant 0 : index
      %c0_10 = arith.constant 0 : index
      %14 = vector.load %arg3[%c0_9, %c0_10] : memref<128x128xf32, #tpu.memory_space<vmem>>, vector<128x128xf32>
      %cst_11 = arith.constant dense<0.000000e+00> : vector<128x128xf32>
      %15 = tpu.matmul %13, %14, %cst_11 {dimension_numbers = #tpu.dot_dimension_numbers<[1], [0], [0], [1], [0, 0, 1, 1], [], []>} : vector<128x128xf32>, vector<128x128xf32>, vector<128x128xf32> -> vector<128x128xf32>
      %c0_12 = arith.constant 0 : index
      %c0_13 = arith.constant 0 : index
      %16 = vector.load %arg5[%c0_12, %c0_13] : memref<128x128xf32, #tpu.memory_space<vmem>>, vector<128x128xf32>
      tpu.vector_store %arg5[%c0_12, %c0_13], %15 {strides = array<i32>} : memref<128x128xf32, #tpu.memory_space<vmem>>, vector<128x128xf32>,
    } else {
    }
    %c128_i32 = arith.constant 128 : i32
    %3 = arith.muli %arg1, %c128_i32 : i32
    %4 = tpu.assume_multiple %3, 128 : i32
    %5 = arith.index_cast %4 : i32 to index
    %c0 = arith.constant 0 : index
    %6 = vector.load %arg5[%5, %c0] : memref<128x128xf32, #tpu.memory_space<vmem>>, vector<128x128xf32>
    %c0_1 = arith.constant 0 : index
    %c0_2 = arith.constant 0 : index
    %7 = vector.load %arg5[%c0_1, %c0_2] : memref<128x128xf32, #tpu.memory_space<vmem>>, vector<128x128xf32>
    %cst = arith.constant dense<0.000000e+00> : vector<128x128xf32>
    %8 = tpu.matmul %6, %7, %cst {dimension_numbers = #tpu.dot_dimension_numbers<[1], [1], [0], [0], [0, 0, 1, 0], [], []>} : vector<128x128xf32>, vector<128x128xf32>, vector<128x128xf32> -> vector<128x128xf32>
    %c0_3 = arith.constant 0 : index
    %c0_4 = arith.constant 0 : index
    %c0_5 = arith.constant 0 : index
    %9 = vector.load %arg4[%c0_3, %c0_4, %c0_5] : memref<1x128x128xf32, #tpu.memory_space<vmem>>, vector<1x128x128xf32>
    %10 = vector.shape_cast %9 : vector<1x128x128xf32> to vector<128x128xf32>
    %11 = vector.shape_cast %8 : vector<128x128xf32> to vector<1x128x128xf32>
    tpu.vector_store %arg4[%c0_3, %c0_4, %c0_5], %11 {strides = array<i32>} : memref<1x128x128xf32, #tpu.memory_space<vmem>>, vector<1x128x128xf32>,
    return
  }
  func.func @transform_0(%arg0: i32, %arg1: i32) -> (i32, i32, i32) {
    %c0_i32 = arith.constant 0 : i32
    %c0_i32_0 = arith.constant 0 : i32
    %c0_i32_1 = arith.constant 0 : i32
    return %arg0, %c0_i32, %c0_i32_0 : i32, i32, i32
  }
  func.func @transform_1(%arg0: i32, %arg1: i32) -> (i32, i32) {
    %c0_i32 = arith.constant 0 : i32
    %c0_i32_0 = arith.constant 0 : i32
    %c0_i32_1 = arith.constant 0 : i32
    return %c0_i32, %c0_i32_0 : i32, i32
  }
  func.func @transform_2(%arg0: i32, %arg1: i32) -> (i32, i32, i32) {
    %c0_i32 = arith.constant 0 : i32
    %c0_i32_0 = arith.constant 0 : i32
    return %arg0, %arg1, %c0_i32 : i32, i32, i32
  }
}

</mosaic_0001>

<bundles_post_ra>
// kernel: tpu_custom_call.1
= control target key start
LH: loop header
LB: loop body
LE: loop exit
PB: predicated region body
PF: predicated region fallthrough
CT: control target
= control target key end

     0   :  { %7 = vsyncpa [#allocation4], 0  ;;  %s1358_s0 = inlined_call_operand.hbm [shape: f32[2,128,128], index: 0, kind: input, shape index: {}]   ;;  %s1359_s1 = inlined_call_operand.hbm [shape: f32[128,128], index: 1, kind: input, shape index: {}]   ;;  %s1360_s2 = inlined_call_operand.hbm [shape: f32[2,128,128], index: 2, kind: output, shape index: {}]  }
   0x1   :  { %9 = vsyncpa [#allocation4 + $0x1], 0 }
   0x2   :  { %10 = vsyncpa [#allocation7], 0 }
   0x3   :  { %11 = vsyncpa [#allocation5], 0 }
   0x4   :  { %13 = vsyncpa [#allocation5 + $0x1], 0  ;;  %s1130_s9 = smov 0   ;;  %s1132_s10 = smov 0  }
   0x5   :  { %s1134_s11 = smov 0   ;;  %s1136_s12 = smov 0  }
   0x6   :  { %s1138_s13 = smov 0   ;;  %s1140_s14 = smov 0  }
   0x7 LB: > { %s696_s15 = sadd.s32 4294967295, %s1106_s14   ;;  %s697_s16 = sadd.s32 4294967294, %s1106_s14   ;;  %s1106_s14 = sphi %s1140_s14, %s19_s14   ;;  %s1102_s13 = sphi %s1138_s13, %s1380_s13   ;;  %s1098_s12 = sphi %s1136_s12, %s1379_s12   ;;  %s1094_s11 = sphi %s1134_s11, %s1378_s11   ;;  %s1090_s10 = sphi %s1132_s10, %s1377_s10   ;;  %s1086_s9 = sphi %s1130_s9, %s1376_s9  }
   0x8   : > { %p51_p0 = scmp.ne.s32.totalorder %s1090_s10, %s1086_s9  ;;  %p1164_p1 = scmp.eq.s32.totalorder %s696_s15, 0 }
   0x9   : > { %p1168_p2 = scmp.eq.s32.totalorder %s696_s15, 1  ;;  %p104_p3 = scmp.eq.s32.totalorder %s697_s16, 1 }
   0xa   : > { %p1174_p4 = por %p1164_p1, %p51_p0  ;;  %p698_p5 = scmp.ge.s32.totalorder %s1106_s14, 1 }
   0xb   : > { %p1179_p6 = por %p104_p3, %p51_p0  ;;  %p111_p7 = scmp.lt.s32.totalorder %s1106_s14, 3 }
   0xc   : > { %s1365_s19 = scalar_select %p1174_p4, 1, 0 }
   0xd   : > { %s1366_s20 = scalar_select %p1179_p6, 1, 0 }
   0xe   : > { %p1184_p8 = pnand %p698_p5, %p111_p7  ;;  %s1108_s22 = smov [#allocation6]  }
   0xf   : > { %s123_s23 = sshll.u32 %s1108_s22, 4  ;;  %s31_s25 = sadd.s32 1, %s1102_s13  ;;  %s124_s23 = int_to_ptr.vmem [resolvable:$true] %s123_s23 }
  0x10   : > { %p899_p9 = pneg %p1184_p8  ;;  %s979_s26 = scalar_lea.vmem %s124_s23, 2048 }
  0x11   : > { %p980_p13 = scmp.ne.s32.totalorder %s124_s23, %s979_s26  ;;  %p987_p5 = scmp.lt.s32.totalorder %s124_s23, %s124_s23 }
  0x12   : > { %p1193_p11 = pnand %p899_p9, %p1164_p1  ;;  %p988_p7 = scmp.lt.s32.totalorder %s979_s26, %s979_s26 }
  0x14   : > { %p970_p12 = pneg %p1193_p11  ;;  %p989_p6 = por %p988_p7, %p987_p5 }
  0x16   : > { %p982_p0 = pnand %p980_p13, %p970_p12 }
  0x18   : > { %p983_p3 = pneg %p982_p0 }
  0x1a   : > { %p990_p4 = pnand %p989_p6, %p983_p3 }
  0x1c   : > { %993 = shalt.err (!%p990_p4)
}
  0x1d   : > { %s1362_s27 = smov 128   ;;  %s1110_s28 = smov 8  }
  0x1e   : > { %902 = dma.hbm_to_vmem [thread:$0]  (!%p1193_p11), %s1359_s1, 2048, %s124_s23, [#allocation7], %s1362_s27, %s1362_s27, %s1110_s28  }
  0x1f   : > { %p33_p4 = scmp.ge.s32.totalorder %s31_s25, 2  ;;  %s38_s3 = sadd.s32 1, %s1094_s11 }
  0x20   : > { %p45_p6 = scmp.ne.s32.totalorder %s1094_s11, %s1090_s10  ;;  %p46_p9 = scmp.eq.s32.totalorder %s1106_s14, 0 }
  0x21   : > { %s1382_s25 = smov (%p33_p4, %s31_s25), 0  ;;  %p912_p0 = scmp.lt.s32.totalorder %s1106_s14, 2 }
  0x22   : > { %p1214_p12 = por %p46_p9, %p45_p6  ;;  %p1220_p13 = por %p1168_p2, %p45_p6 }
  0x23   : > { %s35_s6 = ssub.s32 %s1102_s13, %s1382_s25  ;;  %s137_s7 = sand.u32 1, %s1094_s11  }
  0x24   : > { %p36_p11 = scmp.eq.s32.totalorder %s35_s6, 0  ;;  %s701_s8 = sshll.u32 %s137_s7, 7 }
  0x25   : > { %s713_s16 = sshll.u32 %s1102_s13, 11  ;;  %s141_s26 = scalar_lea.vmem [#allocation3], %s701_s8 }
  0x26   : > { %s1229_s15 = scalar_select %p36_p11, %s1094_s11, %s38_s3  }
  0x27   : > { %s147_s24 = scalar_lea.hbm %s1358_s0, %s713_s16  ;;  %s148_s29 = sshll.u32 %s141_s26, 4  ;;  %s149_s29 = int_to_ptr.vmem [resolvable:$true] %s148_s29 }
  0x28   : > { %p1237_p2 = pnand %p912_p0, %p1214_p12  ;;  %s138_s30 = scalar_lea.sflag [#allocation4], %s137_s7 }
  0x29   : > { %s1007_s6 = scalar_lea.vmem %s149_s29, 2048  ;;  %s1111_s3 = smov [#allocation3]  }
  0x2a   : > { %p996_p3 = pneg %p1237_p2  ;;  %p1008_p5 = scmp.ne.s32.totalorder %s149_s29, %s1007_s6 }
  0x2b   : > { %s1012_s27 = sshll.u32 %s1111_s3, 4  ;;  %s1013_s27 = int_to_ptr.vmem [resolvable:$false] %s1012_s27 }
  0x2c   : > { %p1010_p7 = pnand %p1008_p5, %p996_p3  ;;  %s1014_s16 = scalar_lea.vmem %s1013_s27, 4096 }
  0x2d   : > { %p1015_p6 = scmp.lt.s32.totalorder %s149_s29, %s1013_s27  ;;  %p1016_p9 = scmp.lt.s32.totalorder %s1014_s16, %s1007_s6 }
  0x2e   : > { %p1011_p4 = pneg %p1010_p7 }
  0x2f   : > { %p1017_p11 = por %p1016_p9, %p1015_p6 }
  0x31   : > { %p1018_p10 = pnand %p1017_p11, %p1011_p4 }
  0x33   : > { %1021 = shalt.err (!%p1018_p10)
}
  0x34   : > { %s1372_s4 = smov 128   ;;  %160 = sbr.rel (%p1184_p8) target bundleno = 615 (0x267), region = 28 }
  0x35   : > { %906 = dma.hbm_to_vmem [thread:$0]  (!%p1237_p2), %s147_s24, 2048, %s149_s29, %s138_s30, %s1372_s4, %s1372_s4, %s1110_s28  }
  0x36   : > { %s1251_s7 = sand.u32 (!%p1184_p8), 1, %s1090_s10   ;;  %p1373_p10 = scmp.ne.s32.totalorder (!%p1184_p8), %s1365_s19, 0 }
  0x37   : > { %s705_s27 = sshll.u32 (!%p1184_p8), %s1251_s7, 7  ;;  %s163_s8 = scalar_lea.sflag (!%p1184_p8), [#allocation4], %s1251_s7 }
  0x38   : > { %s1257_s22 = scalar_lea.vmem (!%p1184_p8), [#allocation3], %s705_s27 }
  0x39   : > { %1073 = dma.done.wait (%p1373_p10), %s163_s8, 2048  }
  0x3a   : > { %1075 = vsyncadd (%p1373_p10), %s163_s8, 4294965248 }
  0x3b   : > { %1077 = dma.done.wait (%p1164_p1), [#allocation7], 2048  }
  0x3c   : > { %1079 = vsyncadd (%p1164_p1), [#allocation7], 4294965248  ;;  %v227_v0 = vld [vmem:[#allocation6 + $0x78] sm:$0xff]  ;;  %v226_v1 = vld [vmem:[#allocation6 + $0x70] sm:$0xff]  ;;  %s1285_s17 = scalar_lea.vmem [#allocation8], %s705_s27  ;;  %s714_s19 = sshll.u32 %s1098_s12, 11 }
  0x3d   : > { %779 = vmatprep.subr.mxu0 %v227_v0  ;;  %v225_v2 = vld [vmem:[#allocation6 + $0x68] sm:$0xff]  ;;  %v224_v3 = vld [vmem:[#allocation6 + $0x60] sm:$0xff]  ;;  %v223_v5 = vld [vmem:[#allocation6 + $0x58] sm:$0xff]  ;;  %s600_s21 = sshll.u32 %s1285_s17, 4  ;;  %s1306_s24 = scalar_lea.hbm %s1360_s2, %s714_s19  ;;  %s1308_s21 = int_to_ptr.vmem [resolvable:$true] %s600_s21 }
  0x3e   : > { %780 = vmatpush3.msra.mxu0 %v227_v0  ;;  %v196_v4 = vld [vmem:[%s1257_s22] sm:$0xff]  ;;  %v222_v6 = vld [vmem:[#allocation6 + $0x50] sm:$0xff]  ;;  %v221_v7 = vld [vmem:[#allocation6 + $0x48] sm:$0xff]  ;;  %s585_s26 = scalar_lea.sflag [#allocation5], %s1251_s7  ;;  %s1022_s29 = scalar_lea.vmem %s1308_s21, 2048 }
  0x3f   : > { %781 = vmatprep.subr.mxu0 %v226_v1  ;;  %811 = vmatprep.mubr.f32.mxu0 %v196_v4  ;;  %v220_v8 = vld [vmem:[#allocation6 + $0x40] sm:$0xff]  ;;  %v219_v9 = vld [vmem:[#allocation6 + $0x38] sm:$0xff]  ;;  %v218_v10 = vld [vmem:[#allocation6 + $0x30] sm:$0xff]  ;;  %p1023_p1 = scmp.ne.s32.totalorder %s1308_s21, %s1022_s29  ;;  %s1112_s12 = smov [#allocation8]  }
  0x40   : > { %782 = vmatpush3.msra.mxu0 %v226_v1  ;;  %v217_v11 = vld [vmem:[#allocation6 + $0x28] sm:$0xff]  ;;  %v216_v12 = vld [vmem:[#allocation6 + $0x20] sm:$0xff]  ;;  %v215_v13 = vld [vmem:[#allocation6 + $0x18] sm:$0xff]  ;;  %s1026_s18 = sshll.u32 %s1112_s12, 4  ;;  %s1027_s18 = int_to_ptr.vmem [resolvable:$false] %s1026_s18 }
  0x41   : > { %783 = vmatprep.subr.mxu0 %v225_v2  ;;  %v214_v14 = vld [vmem:[#allocation6 + $0x10] sm:$0xff]  ;;  %v213_v15 = vld [vmem:[#allocation6 + $0x8] sm:$0xff]  ;;  %v212_v16 = vld [vmem:[#allocation6] sm:$0xff]  ;;  %p1024_p8 = pnand %p1023_p1, %p1220_p13  ;;  %s1028_s30 = scalar_lea.vmem %s1027_s18, 4096 }
  0x42   : > { %784 = vmatpush3.msra.mxu0 %v225_v2  ;;  %v197_v17 = vld [vmem:[%s1257_s22 + $0x8] sm:$0xff]  ;;  %v198_v18 = vld [vmem:[%s1257_s22 + $0x10] sm:$0xff]  ;;  %v199_v19 = vld [vmem:[%s1257_s22 + $0x18] sm:$0xff]  ;;  %p1029_p0 = scmp.lt.s32.totalorder %s1308_s21, %s1027_s18  ;;  %p1030_p2 = scmp.lt.s32.totalorder %s1028_s30, %s1022_s29 }
  0x43   : > { %785 = vmatprep.subr.mxu0 %v224_v3  ;;  %v200_v20 = vld [vmem:[%s1257_s22 + $0x20] sm:$0xff]  ;;  %v201_v21 = vld [vmem:[%s1257_s22 + $0x28] sm:$0xff]  ;;  %v202_v22 = vld [vmem:[%s1257_s22 + $0x30] sm:$0xff]  ;;  %p1025_p12 = pneg %p1024_p8 }
  0x44   : > { %786 = vmatpush3.msra.mxu0 %v224_v3  ;;  %v203_v23 = vld [vmem:[%s1257_s22 + $0x38] sm:$0xff]  ;;  %v204_v24 = vld [vmem:[%s1257_s22 + $0x40] sm:$0xff]  ;;  %v205_v25 = vld [vmem:[%s1257_s22 + $0x48] sm:$0xff]  ;;  %p1031_p3 = por %p1030_p2, %p1029_p0 }
  0x45   : > { %787 = vmatprep.subr.mxu0 %v223_v5  ;;  %v206_v26 = vld [vmem:[%s1257_s22 + $0x50] sm:$0xff]  ;;  %v207_v27 = vld [vmem:[%s1257_s22 + $0x58] sm:$0xff]  ;;  %v208_v28 = vld [vmem:[%s1257_s22 + $0x60] sm:$0xff] }
  0x46   : > { %788 = vmatpush3.msra.mxu0 %v223_v5  ;;  %v209_v29 = vld [vmem:[%s1257_s22 + $0x68] sm:$0xff]  ;;  %v210_v30 = vld [vmem:[%s1257_s22 + $0x70] sm:$0xff]  ;;  %v211_v31 = vld [vmem:[%s1257_s22 + $0x78] sm:$0xff]  ;;  %p1032_p5 = pnand %p1031_p3, %p1025_p12 }
  0x47   : > { %789 = vmatprep.subr.mxu0 %v222_v6 }
  0x48   : > { %790 = vmatpush3.msra.mxu0 %v222_v6 }
  0x49   : > { %791 = vmatprep.subr.mxu0 %v221_v7 }
  0x4a   : > { %792 = vmatpush3.msra.mxu0 %v221_v7 }
  0x4b   : > { %793 = vmatprep.subr.mxu0 %v220_v8 }
  0x4c   : > { %794 = vmatpush3.msra.mxu0 %v220_v8 }
  0x4d   : > { %795 = vmatprep.subr.mxu0 %v219_v9 }
  0x4e   : > { %796 = vmatpush3.msra.mxu0 %v219_v9 }
  0x4f   : > { %797 = vmatprep.subr.mxu0 %v218_v10 }
  0x50   : > { %798 = vmatpush3.msra.mxu0 %v218_v10 }
  0x51   : > { %799 = vmatprep.subr.mxu0 %v217_v11 }
  0x52   : > { %800 = vmatpush3.msra.mxu0 %v217_v11 }
  0x53   : > { %801 = vmatprep.subr.mxu0 %v216_v12 }
  0x54   : > { %802 = vmatpush3.msra.mxu0 %v216_v12 }
  0x55   : > { %803 = vmatprep.subr.mxu0 %v215_v13 }
  0x56   : > { %804 = vmatpush3.msra.mxu0 %v215_v13 }
  0x57   : > { %805 = vmatprep.subr.mxu0 %v214_v14 }
  0x58   : > { %806 = vmatpush3.msra.mxu0 %v214_v14 }
  0x59   : > { %807 = vmatprep.subr.mxu0 %v213_v15 }
  0x5a   : > { %808 = vmatpush3.msra.mxu0 %v213_v15 }
  0x5b   : > { %809 = vmatprep.subr.mxu0 %v212_v16 }
  0x5c   : > { %810 = vmatpush3.msra.mxu0 %v212_v16 }
  0x5d   : > { %812 = vmatmul.mubr.f32.vlgmr.msra.gmra.mxu0 %v197_v17 }
  0x5e   : > { %814 = vmatprep.mubr.f32.mxu0 %v198_v18 }
  0x61   : > { %815 = vmatmul.mubr.f32.gmra.mxu0 %v199_v19 }
  0x62   : > { %817 = vmatprep.mubr.f32.mxu0 %v200_v20 }
  0x65   : > { %818 = vmatmul.mubr.f32.gmra.mxu0 %v201_v21 }
  0x66   : > { %820 = vmatprep.mubr.f32.mxu0 %v202_v22 }
  0x69   : > { %821 = vmatmul.mubr.f32.gmra.mxu0 %v203_v23 }
  0x6a   : > { %823 = vmatprep.mubr.f32.mxu0 %v204_v24 }
  0x6d   : > { %824 = vmatmul.mubr.f32.gmra.mxu0 %v205_v25 }
  0x6e   : > { %826 = vmatprep.mubr.f32.mxu0 %v206_v26 }
  0x71   : > { %827 = vmatmul.mubr.f32.gmra.mxu0 %v207_v27 }
  0x72   : > { %829 = vmatprep.mubr.f32.mxu0 %v208_v28 }
  0x75   : > { %830 = vmatmul.mubr.f32.gmra.mxu0 %v209_v29 }
  0x76   : > { %832 = vmatprep.mubr.f32.mxu0 %v210_v30 }
  0x79   : > { %833 = vmatmul.mubr.f32.gmra.mxu0 %v211_v31 }
 0x11d   : > { %v813_v32 = vpop.f32.mrf.mxu0 }
 0x11f   : > { %v294_v33 = vpop.f32.mrf.mxu0 }
 0x120   : > { %867 = vmatprep.mubr.f32.mxu1 %v294_v33 }
 0x121   : > { %v816_v34 = vpop.f32.mrf.mxu0 }
 0x123   : > { %v304_v35 = vpop.f32.mrf.mxu0 }
 0x125   : > { %v819_v36 = vpop.f32.mrf.mxu0 }
 0x127   : > { %v314_v37 = vpop.f32.mrf.mxu0 }
 0x129   : > { %v822_v38 = vpop.f32.mrf.mxu0 }
 0x12b   : > { %v324_v39 = vpop.f32.mrf.mxu0 }
 0x12d   : > { %v825_v40 = vpop.f32.mrf.mxu0 }
 0x12f   : > { %v334_v41 = vpop.f32.mrf.mxu0 }
 0x131   : > { %v828_v42 = vpop.f32.mrf.mxu0 }
 0x133   : > { %v344_v43 = vpop.f32.mrf.mxu0 }
 0x135   : > { %v831_v44 = vpop.f32.mrf.mxu0 }
 0x137   : > { %v354_v45 = vpop.f32.mrf.mxu0 }
 0x139   : > { %v834_v46 = vpop.f32.mrf.mxu0 }
 0x13a   : > { %835 = vmatprep.subr.mxu1 %v834_v46 }
 0x13b   : > { %v364_v47 = vpop.f32.mrf.mxu0  ;;  %836 = vmatpush3.xpose.msra.mxu1 %v834_v46 }
 0x13c   : > { %837 = vmatprep.subr.mxu1 %v364_v47 }
 0x13f   : > { %838 = vmatpush3.xpose.msra.mxu1 %v364_v47 }
 0x140   : > { %839 = vmatprep.subr.mxu1 %v831_v44 }
 0x143   : > { %840 = vmatpush3.xpose.msra.mxu1 %v831_v44 }
 0x144   : > { %841 = vmatprep.subr.mxu1 %v354_v45 }
 0x147   : > { %842 = vmatpush3.xpose.msra.mxu1 %v354_v45 }
 0x148   : > { %843 = vmatprep.subr.mxu1 %v828_v42 }
 0x14b   : > { %844 = vmatpush3.xpose.msra.mxu1 %v828_v42 }
 0x14c   : > { %845 = vmatprep.subr.mxu1 %v344_v43 }
 0x14f   : > { %846 = vmatpush3.xpose.msra.mxu1 %v344_v43 }
 0x150   : > { %847 = vmatprep.subr.mxu1 %v825_v40 }
 0x153   : > { %848 = vmatpush3.xpose.msra.mxu1 %v825_v40 }
 0x154   : > { %849 = vmatprep.subr.mxu1 %v334_v41 }
 0x157   : > { %850 = vmatpush3.xpose.msra.mxu1 %v334_v41 }
 0x158   : > { %851 = vmatprep.subr.mxu1 %v822_v38 }
 0x15b   : > { %852 = vmatpush3.xpose.msra.mxu1 %v822_v38 }
 0x15c   : > { %853 = vmatprep.subr.mxu1 %v324_v39 }
 0x15f   : > { %854 = vmatpush3.xpose.msra.mxu1 %v324_v39 }
 0x160   : > { %855 = vmatprep.subr.mxu1 %v819_v36 }
 0x163   : > { %856 = vmatpush3.xpose.msra.mxu1 %v819_v36 }
 0x164   : > { %857 = vmatprep.subr.mxu1 %v314_v37 }
 0x167   : > { %858 = vmatpush3.xpose.msra.mxu1 %v314_v37 }
 0x168   : > { %859 = vmatprep.subr.mxu1 %v816_v34 }
 0x16b   : > { %860 = vmatpush3.xpose.msra.mxu1 %v816_v34 }
 0x16c   : > { %861 = vmatprep.subr.mxu1 %v304_v35 }
 0x16f   : > { %862 = vmatpush3.xpose.msra.mxu1 %v304_v35 }
 0x170   : > { %863 = vmatprep.subr.mxu1 %v813_v32 }
 0x173   : > { %864 = vmatpush3.xpose.msra.mxu1 %v813_v32 }
 0x174   : > { %865 = vmatprep.subr.mxu1 %v294_v33 }
 0x177   : > { %866 = vmatpush3.xpose.msra.mxu1 %v294_v33 }
 0x17a   : > { %868 = vmatmul.mubr.f32.vlgmr.msra.gmra.mxu1 %v813_v32 }
 0x17b   : > { %870 = vmatprep.mubr.f32.mxu1 %v304_v35 }
 0x17e   : > { %871 = vmatmul.mubr.f32.gmra.mxu1 %v816_v34 }
 0x17f   : > { %873 = vmatprep.mubr.f32.mxu1 %v314_v37 }
 0x182   : > { %874 = vmatmul.mubr.f32.gmra.mxu1 %v819_v36 }
 0x183   : > { %876 = vmatprep.mubr.f32.mxu1 %v324_v39 }
 0x186   : > { %877 = vmatmul.mubr.f32.gmra.mxu1 %v822_v38 }
 0x187   : > { %879 = vmatprep.mubr.f32.mxu1 %v334_v41 }
 0x18a   : > { %880 = vmatmul.mubr.f32.gmra.mxu1 %v825_v40 }
 0x18b   : > { %882 = vmatprep.mubr.f32.mxu1 %v344_v43 }
 0x18e   : > { %883 = vmatmul.mubr.f32.gmra.mxu1 %v828_v42 }
 0x18f   : > { %885 = vmatprep.mubr.f32.mxu1 %v354_v45 }
 0x192   : > { %886 = vmatmul.mubr.f32.gmra.mxu1 %v831_v44 }
 0x193   : > { %888 = vmatprep.mubr.f32.mxu1 %v364_v47 }
 0x196   : > { %889 = vmatmul.mubr.f32.gmra.mxu1 %v834_v46 }
 0x23a   : > { %v869_v48 = vpop.f32.mrf.mxu1 }
 0x23b   : > { %569 = vst [vmem:[%s1285_s17 + $0x8] sm:$0xff] %v869_v48 }
 0x23c   : > { %v489_v49 = vpop.f32.mrf.mxu1 }
 0x23d   : > { %568 = vst [vmem:[%s1285_s17] sm:$0xff] %v489_v49 }
 0x23e   : > { %v872_v50 = vpop.f32.mrf.mxu1 }
 0x23f   : > { %571 = vst [vmem:[%s1285_s17 + $0x18] sm:$0xff] %v872_v50 }
 0x240   : > { %v499_v51 = vpop.f32.mrf.mxu1 }
 0x241   : > { %570 = vst [vmem:[%s1285_s17 + $0x10] sm:$0xff] %v499_v51 }
 0x242   : > { %v875_v52 = vpop.f32.mrf.mxu1 }
 0x243   : > { %573 = vst [vmem:[%s1285_s17 + $0x28] sm:$0xff] %v875_v52 }
 0x244   : > { %v509_v53 = vpop.f32.mrf.mxu1 }
 0x245   : > { %572 = vst [vmem:[%s1285_s17 + $0x20] sm:$0xff] %v509_v53 }
 0x246   : > { %v878_v54 = vpop.f32.mrf.mxu1 }
 0x247   : > { %575 = vst [vmem:[%s1285_s17 + $0x38] sm:$0xff] %v878_v54 }
 0x248   : > { %v519_v55 = vpop.f32.mrf.mxu1 }
 0x249   : > { %574 = vst [vmem:[%s1285_s17 + $0x30] sm:$0xff] %v519_v55 }
 0x24a   : > { %v881_v56 = vpop.f32.mrf.mxu1 }
 0x24b   : > { %577 = vst [vmem:[%s1285_s17 + $0x48] sm:$0xff] %v881_v56 }
 0x24c   : > { %v529_v57 = vpop.f32.mrf.mxu1 }
 0x24d   : > { %576 = vst [vmem:[%s1285_s17 + $0x40] sm:$0xff] %v529_v57 }
 0x24e   : > { %v884_v58 = vpop.f32.mrf.mxu1 }
 0x24f   : > { %579 = vst [vmem:[%s1285_s17 + $0x58] sm:$0xff] %v884_v58 }
 0x250   : > { %v539_v59 = vpop.f32.mrf.mxu1 }
 0x251   : > { %578 = vst [vmem:[%s1285_s17 + $0x50] sm:$0xff] %v539_v59 }
 0x252   : > { %v887_v60 = vpop.f32.mrf.mxu1 }
 0x253   : > { %581 = vst [vmem:[%s1285_s17 + $0x68] sm:$0xff] %v887_v60 }
 0x254   : > { %v549_v61 = vpop.f32.mrf.mxu1 }
 0x255   : > { %580 = vst [vmem:[%s1285_s17 + $0x60] sm:$0xff] %v549_v61 }
 0x256   : > { %v890_v62 = vpop.f32.mrf.mxu1 }
 0x257   : > { %583 = vst [vmem:[%s1285_s17 + $0x78] sm:$0xff] %v890_v62 }
 0x258   : > { %v559_v63 = vpop.f32.mrf.mxu1 }
 0x259   : > { %582 = vst [vmem:[%s1285_s17 + $0x70] sm:$0xff] %v559_v63 }
 0x25a   : > { %1035 = shalt.err (!%p1032_p5)
}
 0x25b   : > { %s1036_s6 = scalar_lea.hbm %s1306_s24, 2048  ;;  %s1040_s4 = scalar_lea.hbm %s1360_s2, 4096 }
 0x25c   : > { %p1037_p7 = scmp.ne.s32.totalorder %s1306_s24, %s1036_s6  ;;  %p1041_p9 = scmp.lt.s32.totalorder %s1306_s24, %s1360_s2 }
 0x25d   : > { %p1042_p11 = scmp.lt.s32.totalorder %s1040_s4, %s1036_s6 }
 0x25e   : > { %p1038_p4 = pnand %p1037_p7, %p1220_p13 }
 0x25f   : > { %p1043_p10 = por %p1042_p11, %p1041_p9 }
 0x260   : > { %p1039_p6 = pneg %p1038_p4 }
 0x262   : > { %p1044_p1 = pnand %p1043_p10, %p1039_p6 }
 0x264   : > { %1047 = shalt.err (!%p1044_p1)
}
 0x265   : > { %s1113_s22 = smov 128   ;;  %s1114_s17 = smov 8  }
 0x266   : > { %897 = dma.vmem_to_hbm [thread:$0]  (%p1220_p13), %s1308_s21, 2048, %s1306_s24, %s585_s26, %s1113_s22, %s1113_s22, %s1114_s17  }
 0x267 PF: > { %s615_s19 = sand.u32 1, %s1086_s9   ;;  %p1374_p8 = scmp.ne.s32.totalorder %s1366_s20, 0 }
 0x268   : > { %p1375_p12 = scmp.ge.s32.totalorder %s1106_s14, 2  ;;  %s616_s28 = scalar_lea.sflag [#allocation5], %s615_s19 }
 0x26a   : > { %p908_p0 = pnand %p1375_p12, %p1374_p8 }
 0x26c   : > { %p909_p2 = pneg %p908_p0 }
 0x26e   : > { %1081 = dma.done.wait (%p909_p2), %s616_s28, 2048  }
 0x26f   : > { %1083 = vsyncadd (%p909_p2), %s616_s28, 4294965248  ;;  %s19_s14 = sadd.s32 1, %s1106_s14   ;;  %s1376_s9 = smov %s1090_s10 }
 0x270   : > { %p16_p3 = scmp.ge.s32.totalorder %s19_s14, 4   ;;  %s1377_s10 = smov %s1094_s11 }
 0x271   : > { %s1378_s11 = smov %s1229_s15  ;;  %s1379_s12 = smov %s1102_s13 }
 0x272   : > { %s1380_s13 = smov %s1382_s25  ;;  %18 = sbr.rel (!%p16_p3) target bundleno = 7 (0x7), region = 82 }
 0x277   :  { %621 = vsyncpa [#allocation4], 1 }
 0x278   :  { %623 = vsyncpa [#allocation4 + $0x1], 1 }
 0x279   :  { %624 = vsyncpa [#allocation7], 1 }
 0x27a   :  { %625 = vsyncpa [#allocation5], 1 }
 0x27b   :  { %627 = vsyncpa [#allocation5 + $0x1], 1 }

</bundles_post_ra>
